<compile_context>
chip_gen: v5e
topology: v5e:2x2
jax: 0.10.0
libtpu: 0.0.40
codegen_flags: <defaults>
</compile_context>

<pallas_src>
import functools
import math

import jax
import jax.numpy as jnp
from jax.experimental import pallas as pl
from jax.experimental.pallas import tpu as pltpu


# ----------------------------------------------------------------------------
# Helpers: padding-aware VMEM sizing and generation-aware limits.
# ----------------------------------------------------------------------------
def _round_up(n, m):
    return (n + m - 1) // m * m


def _sublane_multiple(dtype):
    # 8 rows for 32-bit, 16 for 16-bit, 32 for 8-bit element types.
    return max(8, 32 // jnp.dtype(dtype).itemsize)


def _padded_plane_bytes(C, H, W, dtype):
    """VMEM bytes of one (C, H, W) block after Mosaic (sublane, 128-lane) tiling."""
    it = jnp.dtype(dtype).itemsize
    return C * _round_up(H, _sublane_multiple(dtype)) * _round_up(W, 128) * it


def _default_vmem_limit_bytes():
    """Generation-aware scoped-VMEM limit (~75% of physical VMEM)."""
    try:
        info = pltpu.get_tpu_info()
        for attr in ("vmem_capacity_bytes", "vmem_size_bytes"):
            cap = getattr(info, attr, None)
            if cap:
                return int(cap) * 3 // 4          # ~96 MiB v5e/v6e, ~48 MiB v7x
    except Exception:                              # defensive: query may fail
        pass
    return 48 * 1024 * 1024                        # safe floor (v7x physical = 64 MiB)


def _choose_slab_h(H, target_rows=64):
    """Largest multiple-of-8 divisor of H that is <= target_rows, else H."""
    if H <= target_rows:
        return H
    cands = [d for d in range(8, target_rows + 1, 8) if H % d == 0]
    return max(cands) if cands else H


def _fused_vmem_bytes(C, H, W, mch, dtype, slab_h, image_buffers):
    f32b = 4
    img = _padded_plane_bytes(C, H, W, dtype)
    C8, M8 = _round_up(C, 8), _round_up(mch, 8)
    H128, W128 = _round_up(H, 128), _round_up(W, 128)
    weights = 2 * f32b * (M8 * _round_up(C, 128) + C8 * _round_up(mch, 128)
                          + 2 * M8 * 128)
    rows = f32b * C8 * (3 * H128 + 3 * W128 + 2 * 128)   # row_sum/a_h/scratch, x_w/col_max/a_w, pooled/se
    slabs = 2 * f32b * C * _round_up(slab_h, 8) * W128   # f32 x-slab + f-slab temporaries
    return 2 * image_buffers * img + weights + rows + slabs


def _choose_tile_h(C, H, W, mch, dtype, budget):
    """Row-tile height for the two-pass path, sized from per-pass footprints
    (pass B is the stricter one: 2x in + 2x out blocks + f32 temporaries)."""
    it = jnp.dtype(dtype).itemsize
    f32b = 4
    C8, M8 = _round_up(C, 8), _round_up(mch, 8)
    W128 = _round_up(W, 128)
    const = (2 * f32b * (M8 * _round_up(C, 128) + C8 * _round_up(mch, 128)
                         + 2 * M8 * 128)
             + 6 * f32b * C8 * W128 + 4 * f32b * C8 * 128)
    row_a = C * W128 * 3 * it + 4 * f32b * C8            # 2x in blocks + masked copy + a_h rows
    row_b = C * W128 * (4 * it + 2 * f32b) + 4 * f32b * C8
    avail = max(budget - const, 8 * max(row_a, row_b))
    tile_h = min(avail // row_a, avail // row_b, _round_up(H, 8))
    return max(8, int(tile_h) // 8 * 8)


# ----------------------------------------------------------------------------
# Fused single-pass kernel (whole image per grid step) -- used when it fits VMEM.
# ----------------------------------------------------------------------------
def _fused_kernel(x_ref, w10_ref, w11_ref, s10_ref, b10_ref, o_ref, ah_sc,
                  *, slab_h):
    f32 = jnp.float32
    x = x_ref[0]                                        # (C, H, W) native dtype
    C, H, W = x.shape

    # f32-accumulated reductions straight from the native-dtype tile.
    row_sum = jnp.sum(x, axis=2, dtype=f32)             # (C, H)  W lane-reduces
    x_w = jnp.sum(x, axis=1, dtype=f32) * (1.0 / H)     # (C, W)  cheap sublane reduce
    col_max = jnp.max(x, axis=1)                        # (C, W)  sublane max first,
    x_max = jnp.max(col_max.astype(f32), axis=1, keepdims=True)   # then 1 lane reduce
    pooled = jnp.sum(row_sum, axis=1, keepdims=True) * (1.0 / (H * W)) + x_max

    w10 = w10_ref[...]                                  # (mch, C) f32
    w11 = w11_ref[...]                                  # (C, mch) f32
    s10 = s10_ref[...]                                  # (mch, 1) f32 (folded BN scale)
    b10 = b10_ref[...]                                  # (mch, 1) f32 (folded BN bias)

    def ca_branch(v):                                   # v: (C, L) f32
        t = jnp.maximum(
            s10 * jnp.dot(w10, v, preferred_element_type=f32) + b10, 0.0)
        return jax.nn.sigmoid(jnp.dot(w11, t, preferred_element_type=f32))

    ah_sc[...] = ca_branch(row_sum * (1.0 / W))         # (C, H) f32 -> scratch
    a_w = ca_branch(x_w)                                # (C, W)
    t_se = jnp.maximum(
        jnp.dot(w10, pooled, preferred_element_type=f32), 0.0)
    se = jnp.dot(w11, t_se, preferred_element_type=f32)   # (C, 1)

    aw_b = a_w[:, None, :]                              # (C, 1, W)
    se_b = se[:, :, None]                               # (C, 1, 1)
    out_dtype = o_ref.dtype
    n_slabs = H // slab_h

    # H-slab loop: never materialise the full (C, H, W) f32 scale map; math
    # stays in f32 and there is exactly one cast, at the store.
    def slab(i):
        h0 = i * slab_h
        if not isinstance(i, int):
            h0 = pl.multiple_of(h0, slab_h)
        xs = x_ref[0, :, pl.ds(h0, slab_h), :].astype(f32)    # (C, slab_h, W)
        ah = ah_sc[:, pl.ds(h0, slab_h)]                      # (C, slab_h)
        f = ah[:, :, None] * aw_b + se_b
        o_ref[0, :, pl.ds(h0, slab_h), :] = (xs * f).astype(out_dtype)

    if n_slabs == 1:
        slab(0)
    else:
        pl.loop(0, n_slabs)(slab)


def _se_sa_fused(x, w10, w11, s10, b10, slab_h, image_buffers, vmem_limit_bytes):
    B, C, H, W = x.shape
    mch = w10.shape[0]
    img_map = lambda b: (b, 0, 0, 0)
    if image_buffers == 2:
        in_img = pl.BlockSpec((1, C, H, W), img_map)
        out_img = pl.BlockSpec((1, C, H, W), img_map)
    else:
        # B == 1: the grid has a single step, so double-buffering the image
        # blocks buys no overlap -- single-buffer them (halves fused VMEM, so
        # ~2x larger single images stay on the 2x-HBM-traffic fused path).
        mode = pl.Buffered(image_buffers)
        in_img = pl.BlockSpec((1, C, H, W), img_map, pipeline_mode=mode)
        out_img = pl.BlockSpec((1, C, H, W), img_map, pipeline_mode=mode)

    kernel = functools.partial(_fused_kernel, slab_h=slab_h)
    return pl.pallas_call(
        kernel,
        out_shape=jax.ShapeDtypeStruct((B, C, H, W), x.dtype),
        grid_spec=pltpu.PrefetchScalarGridSpec(
            num_scalar_prefetch=0,
            grid=(B,),
            in_specs=[
                in_img,
                pl.BlockSpec((mch, C), lambda b: (0, 0)),
                pl.BlockSpec((C, mch), lambda b: (0, 0)),
                pl.BlockSpec((mch, 1), lambda b: (0, 0)),
                pl.BlockSpec((mch, 1), lambda b: (0, 0)),
            ],
            out_specs=out_img,
            scratch_shapes=[pltpu.VMEM((C, H), jnp.float32)],
        ),
        compiler_params=pltpu.CompilerParams(
            dimension_semantics=("parallel",),
            vmem_limit_bytes=vmem_limit_bytes),
    )(x, w10, w11, s10, b10)


# ----------------------------------------------------------------------------
# Two-pass path (row-tiled), for images that do not fit the VMEM budget.
# ----------------------------------------------------------------------------
def _reduce_attn_kernel(x_ref, w10_ref, w11_ref, s10_ref, b10_ref,
                        a_h_ref, a_w_ref, se_ref,
                        sumw_sc, sum_sc, max_sc,
                        *, tile_h, total_h, total_w, ragged):
    f32 = jnp.float32
    j = pl.program_id(1)
    last = pl.num_programs(1) - 1

    @pl.when(j == 0)
    def _init():
        sumw_sc[...] = jnp.zeros_like(sumw_sc)
        sum_sc[...] = jnp.zeros_like(sum_sc)
        max_sc[...] = jnp.full_like(max_sc, -jnp.inf)

    x = x_ref[0]                                        # (C, tile_h, W) native dtype
    if ragged:
        # cdiv grid: the last tile's padding rows are undefined -- mask them
        # (0 for the sums, -inf for the max).
        rows = j * tile_h + jax.lax.broadcasted_iota(
            jnp.int32, (tile_h, total_w), 0)
        valid = (rows < total_h)[None, :, :]
        x_sum = jnp.where(valid, x, jnp.zeros((), x.dtype))
        x_max = jnp.where(valid, x, jnp.asarray(-jnp.inf, x.dtype))
    else:
        x_sum = x
        x_max = x

    row_sum = jnp.sum(x_sum, axis=2, dtype=f32)         # (C, tile_h)
    col_sum = jnp.sum(x_sum, axis=1, dtype=f32)         # (C, W)   sublane reduce
    col_max = jnp.max(x_max, axis=1)                    # (C, W)   sublane max first,
    tile_max = jnp.max(col_max.astype(f32), axis=1, keepdims=True)  # then 1 lane reduce

    w10 = w10_ref[...]
    w11 = w11_ref[...]
    s10 = s10_ref[...]
    b10 = b10_ref[...]

    def ca_branch(v):                                   # v: (C, L) f32
        t = jnp.maximum(
            s10 * jnp.dot(w10, v, preferred_element_type=f32) + b10, 0.0)
        return jax.nn.sigmoid(jnp.dot(w11, t, preferred_element_type=f32))

    # The 1x1 convs are per-position, so this tile's a_h rows are complete now:
    # store them as a dense, lane-aligned full block (no (C, H) scratch and no
    # masked dynamic-lane stores).
    a_h_ref[0, 0] = ca_branch(row_sum * (1.0 / total_w))          # (C, tile_h)

    sumw_sc[...] += col_sum
    sum_sc[...] += jnp.sum(row_sum, axis=1, keepdims=True)
    max_sc[...] = jnp.maximum(max_sc[...], tile_max)

    @pl.when(j == last)
    def _finalize():
        a_w_ref[0] = ca_branch(sumw_sc[...] * (1.0 / total_h))    # (C, W)
        pooled = sum_sc[...] * (1.0 / (total_h * total_w)) + max_sc[...]
        t_se = jnp.maximum(
            jnp.dot(w10, pooled, preferred_element_type=f32), 0.0)
        se_ref[0] = jnp.dot(w11, t_se, preferred_element_type=f32)  # (C, 1)


def _apply_kernel(x_ref, a_h_ref, a_w_ref, se_ref, o_ref):
    f32 = jnp.float32
    x = x_ref[0].astype(f32)                            # (C, tile_h, W)
    ah = a_h_ref[0, 0]                                  # (C, tile_h) f32
    aw = a_w_ref[0]                                     # (C, W)      f32
    se = se_ref[0]                                      # (C, 1)      f32
    f = ah[:, :, None] * aw[:, None, :] + se[:, :, None]
    o_ref[0] = (x * f).astype(o_ref.dtype)


def _se_sa_two_pass(x, w10, w11, s10, b10, tile_h, vmem_limit_bytes):
    B, C, H, W = x.shape
    mch = w10.shape[0]
    nH = pl.cdiv(H, tile_h)
    ragged = (H % tile_h) != 0
    f32 = jnp.float32

    reduce_kernel = functools.partial(
        _reduce_attn_kernel, tile_h=tile_h, total_h=H, total_w=W, ragged=ragged)
    a_h, a_w, se = pl.pallas_call(
        reduce_kernel,
        out_shape=(
            jax.ShapeDtypeStruct((B, nH, C, tile_h), f32),
            jax.ShapeDtypeStruct((B, C, W), f32),
            jax.ShapeDtypeStruct((B, C, 1), f32),
        ),
        grid_spec=pltpu.PrefetchScalarGridSpec(
            num_scalar_prefetch=0,
            grid=(B, nH),
            in_specs=[
                pl.BlockSpec((1, C, tile_h, W), lambda b, j: (b, 0, j, 0)),
                pl.BlockSpec((mch, C), lambda b, j: (0, 0)),
                pl.BlockSpec((C, mch), lambda b, j: (0, 0)),
                pl.BlockSpec((mch, 1), lambda b, j: (0, 0)),
                pl.BlockSpec((mch, 1), lambda b, j: (0, 0)),
            ],
            out_specs=[
                pl.BlockSpec((1, 1, C, tile_h), lambda b, j: (b, j, 0, 0)),
                pl.BlockSpec((1, C, W), lambda b, j: (b, 0, 0)),
                pl.BlockSpec((1, C, 1), lambda b, j: (b, 0, 0)),
            ],
            scratch_shapes=[
                pltpu.VMEM((C, W), f32),   # running sum over H
                pltpu.VMEM((C, 1), f32),   # running total sum
                pltpu.VMEM((C, 1), f32),   # running max
            ],
        ),
        compiler_params=pltpu.CompilerParams(
            dimension_semantics=("parallel", "arbitrary"),
            vmem_limit_bytes=vmem_limit_bytes),
    )(x, w10, w11, s10, b10)

    return pl.pallas_call(
        _apply_kernel,
        out_shape=jax.ShapeDtypeStruct((B, C, H, W), x.dtype),
        grid_spec=pltpu.PrefetchScalarGridSpec(
            num_scalar_prefetch=0,
            grid=(B, nH),
            in_specs=[
                pl.BlockSpec((1, C, tile_h, W), lambda b, j: (b, 0, j, 0)),
                pl.BlockSpec((1, 1, C, tile_h), lambda b, j: (b, j, 0, 0)),
                pl.BlockSpec((1, C, W), lambda b, j: (b, 0, 0)),
                pl.BlockSpec((1, C, 1), lambda b, j: (b, 0, 0)),
            ],
            out_specs=pl.BlockSpec((1, C, tile_h, W), lambda b, j: (b, 0, j, 0)),
        ),
        compiler_params=pltpu.CompilerParams(
            dimension_semantics=("parallel", "parallel"),
            vmem_limit_bytes=vmem_limit_bytes),
    )(x, a_h, a_w, se)


# ----------------------------------------------------------------------------
# Public wrapper: BN folding, weight pre-layout, VMEM-budget-driven path choice.
# ----------------------------------------------------------------------------
def se_sa(x, w10, w11, bn_gamma, bn_beta, bn_mean, bn_var, eps=1e-5, *,
          vmem_limit_bytes=None, force_two_pass=False, tile_h=None):
    """x: (B, C, H, W); w10: (mch, C[,1,1]); w11: (C, mch[,1,1]); BN params (mch,)."""
    B, C, H, W = (int(d) for d in x.shape)
    mch = int(bn_gamma.shape[0])
    f32 = jnp.float32

    if vmem_limit_bytes is None:
        vmem_limit_bytes = _default_vmem_limit_bytes()
    budget = vmem_limit_bytes - (2 << 20)          # headroom for internal scratch

    # Fold eval-mode BatchNorm into a per-channel scale + bias applied after
    # conv10: bn10(conv10(v)) = s10 * (w10 @ v) + b10.
    s = bn_gamma.astype(f32) / jnp.sqrt(bn_var.astype(f32) + eps)
    s10 = s.reshape(mch, 1)
    b10 = (bn_beta.astype(f32) - s * bn_mean.astype(f32)).reshape(mch, 1)
    w10 = jnp.asarray(w10).reshape(mch, C).astype(f32)
    w11 = jnp.asarray(w11).reshape(C, mch).astype(f32)

    # Fused-path fit check: padding-aware (128 lanes / sublane multiple) and
    # counts the pipelined image buffers explicitly.
    slab_h = _choose_slab_h(H)
    image_buffers = 1 if B == 1 else 2             # grid=(1,) cannot pipeline
    fits_fused = _fused_vmem_bytes(
        C, H, W, mch, x.dtype, slab_h, image_buffers) <= budget

    if not force_two_pass and fits_fused:
        return _se_sa_fused(x, w10, w11, s10, b10, slab_h, image_buffers,
                            vmem_limit_bytes)

    # Two-pass (row-tiled) path for images that do not fit the VMEM budget.
    if tile_h is None:
        tile_h = _choose_tile_h(C, H, W, mch, x.dtype, budget)
        # TODO(synk): for very large C*W even tile_h=8 may exceed the scoped
        # budget; a W-tiled variant would be needed there.
    tile_h = max(8, min(int(tile_h), _round_up(H, 8)) // 8 * 8)
    return _se_sa_two_pass(x, w10, w11, s10, b10, tile_h, vmem_limit_bytes)


# ----------------------------------------------------------------------------
# Pure-JAX reference (mirrors the PyTorch forward, eval-mode BatchNorm).
# ----------------------------------------------------------------------------
def se_sa_reference(x, w10, w11, bn_gamma, bn_beta, bn_mean, bn_var, eps=1e-5):
    b, c, h, w = x.shape
    mch = int(bn_gamma.shape[0])
    w10 = jnp.asarray(w10).reshape(mch, c).astype(jnp.float32)
    w11 = jnp.asarray(w11).reshape(c, mch).astype(jnp.float32)
    xf = x.astype(jnp.float32)

    x_h = jnp.mean(xf, axis=3)                          # (b, c, h)
    x_w = jnp.mean(xf, axis=2)                          # (b, c, w)
    cat = jnp.concatenate([x_h, x_w], axis=2)           # (b, c, h + w)

    def conv10(v):
        return jnp.einsum("oc,bcl->bol", w10, v)

    def conv11(v):
        return jnp.einsum("co,bol->bcl", w11, v)

    s = bn_gamma / jnp.sqrt(bn_var + eps)
    t = conv10(cat)
    t = s[None, :, None] * (t - bn_mean[None, :, None]) + bn_beta[None, :, None]
    t = jax.nn.relu(t)
    t_h, t_w = t[:, :, :h], t[:, :, h:]
    a_h = jax.nn.sigmoid(conv11(t_h))                   # (b, c, h)
    a_w = jax.nn.sigmoid(conv11(t_w))                   # (b, c, w)
    f_ca = a_h[:, :, :, None] * a_w[:, :, None, :]      # (b, c, h, w)

    pooled = (jnp.mean(xf, axis=(2, 3)) + jnp.max(xf, axis=(2, 3)))[:, :, None]
    f_se = conv11(jax.nn.relu(conv10(pooled)))          # (b, c, 1)
    return (xf * (f_ca + f_se[:, :, :, None])).astype(x.dtype)


if __name__ == "__main__":
    reduction = 16

    def init_params(C, key):
        mch = max(8, C // reduction)
        k10, k11, kg, kb, km, kv = jax.random.split(key, 6)
        bnd10 = 1.0 / math.sqrt(C)
        bnd11 = 1.0 / math.sqrt(mch)
        w10 = jax.random.uniform(k10, (mch, C), jnp.float32, -bnd10, bnd10)
        w11 = jax.random.uniform(k11, (C, mch), jnp.float32, -bnd11, bnd11)
        bn_gamma = jax.random.uniform(kg, (mch,), jnp.float32, 0.5, 1.5)
        bn_beta = 0.1 * jax.random.normal(kb, (mch,), jnp.float32)
        bn_mean = 0.1 * jax.random.normal(km, (mch,), jnp.float32)
        bn_var = jax.random.uniform(kv, (mch,), jnp.float32, 0.5, 1.5)
        return w10, w11, bn_gamma, bn_beta, bn_mean, bn_var

    key = jax.random.PRNGKey(0)
    kp, kx1, kx2, kx3 = jax.random.split(key, 4)

    # 1) Baseline shape: fused path and forced two-pass path.
    B, C, H, W = 2, 4, 16, 16
    params = init_params(C, kp)
    x = jax.random.normal(kx1, (B, C, H, W), jnp.float32)
    ref = se_sa_reference(x, *params)
    out_fused = jax.block_until_ready(se_sa(x, *params))
    out_two = jax.block_until_ready(
        se_sa(x, *params, force_two_pass=True, tile_h=8))
    assert out_fused.shape == (B, C, H, W)
    assert jnp.allclose(out_fused, ref, atol=1e-5, rtol=1e-4), "fused mismatch"
    assert jnp.allclose(out_two, ref, atol=1e-5, rtol=1e-4), "two-pass mismatch"

    # 2) Ragged H (cdiv grid + masked tail in the reduce pass) and fused path
    #    on the same odd shape.
    x2 = jax.random.normal(kx2, (2, C, 20, 24), jnp.float32)
    ref2 = se_sa_reference(x2, *params)
    out2_f = jax.block_until_ready(se_sa(x2, *params))
    out2_t = jax.block_until_ready(
        se_sa(x2, *params, force_two_pass=True, tile_h=8))
    assert jnp.allclose(out2_f, ref2, atol=1e-5, rtol=1e-4), "ragged fused mismatch"
    assert jnp.allclose(out2_t, ref2, atol=1e-5, rtol=1e-4), "ragged two-pass mismatch"

    # 3) Larger H exercises the fused H-slab loop (slab_h=64, 2 slabs).
    C3 = 8
    params3 = init_params(C3, kp)
    x3 = jax.random.normal(kx3, (2, C3, 128, 128), jnp.float32)
    ref3 = se_sa_reference(x3, *params3)
    out3 = jax.block_until_ready(se_sa(x3, *params3))
    assert jnp.allclose(out3, ref3, atol=1e-5, rtol=1e-4), "slab-loop mismatch"

    # 4) bf16 input: kernel math stays in f32 with a single cast at the store.
    xb = x.astype(jnp.bfloat16)
    refb = se_sa_reference(xb, *params)
    outb = jax.block_until_ready(se_sa(xb, *params))
    assert outb.dtype == jnp.bfloat16
    assert jnp.allclose(outb.astype(jnp.float32), refb.astype(jnp.float32),
                        atol=2e-2, rtol=2e-2), "bf16 mismatch"

    print("KERNEL_OK")
</pallas_src>

<mosaic_0001>
module attributes {stable_mosaic.version = 11 : i64} {
  func.func @_fused_kernel(%arg0: i32, %arg1: memref<1x4x16x16xf32, #tpu.memory_space<vmem>>, %arg2: memref<8x4xf32, #tpu.memory_space<vmem>>, %arg3: memref<4x8xf32, #tpu.memory_space<vmem>>, %arg4: memref<8x1xf32, #tpu.memory_space<vmem>>, %arg5: memref<8x1xf32, #tpu.memory_space<vmem>>, %arg6: memref<1x4x16x16xf32, #tpu.memory_space<vmem>>, %arg7: memref<4x16xf32, #tpu.memory_space<vmem>>) attributes {dimension_semantics = [#tpu.dimension_semantics<parallel>], iteration_bounds = array<i64: 2>, scalar_prefetch = 0 : i64, scratch_operands = 1 : i64, tpu.core_type = #tpu.core_type<tc>, window_params = [{transform_indices = @transform_0, window_bounds = array<i64: 1, 4, 16, 16>}, {pipeline_mode = #tpu.pipeline_mode<synchronous>, transform_indices = @transform_1, window_bounds = array<i64: 8, 4>}, {pipeline_mode = #tpu.pipeline_mode<synchronous>, transform_indices = @transform_2, window_bounds = array<i64: 4, 8>}, {pipeline_mode = #tpu.pipeline_mode<synchronous>, transform_indices = @transform_3, window_bounds = array<i64: 8, 1>}, {pipeline_mode = #tpu.pipeline_mode<synchronous>, transform_indices = @transform_4, window_bounds = array<i64: 8, 1>}, {transform_indices = @transform_5, window_bounds = array<i64: 1, 4, 16, 16>}]} {
    %c0 = arith.constant 0 : index
    %c0_0 = arith.constant 0 : index
    %c0_1 = arith.constant 0 : index
    %c0_2 = arith.constant 0 : index
    %0 = vector.load %arg1[%c0, %c0_0, %c0_1, %c0_2] : memref<1x4x16x16xf32, #tpu.memory_space<vmem>>, vector<1x4x16x16xf32>
    %1 = vector.shape_cast %0 : vector<1x4x16x16xf32> to vector<4x16x16xf32>
    %cst = arith.constant dense<0.000000e+00> : vector<4x16xf32>
    %2 = vector.multi_reduction <add>, %1, %cst [2] : vector<4x16x16xf32> to vector<4x16xf32>
    %cst_3 = arith.constant dense<0.000000e+00> : vector<4x16xf32>
    %3 = vector.multi_reduction <add>, %1, %cst_3 [1] : vector<4x16x16xf32> to vector<4x16xf32>
    %cst_4 = arith.constant 6.250000e-02 : f32
    %4 = vector.broadcast %cst_4 : f32 to vector<4x16xf32>
    %5 = arith.mulf %3, %4 : vector<4x16xf32>
    %cst_5 = arith.constant dense<0xFF800000> : vector<4x16xf32>
    %6 = vector.multi_reduction <maximumf>, %1, %cst_5 [1] : vector<4x16x16xf32> to vector<4x16xf32>
    %cst_6 = arith.constant dense<0xFF800000> : vector<4xf32>
    %7 = vector.multi_reduction <maximumf>, %6, %cst_6 [1] : vector<4x16xf32> to vector<4xf32>
    %8 = vector.shape_cast %7 : vector<4xf32> to vector<4x1xf32>
    %cst_7 = arith.constant dense<0.000000e+00> : vector<4xf32>
    %9 = vector.multi_reduction <add>, %2, %cst_7 [1] : vector<4x16xf32> to vector<4xf32>
    %10 = vector.shape_cast %9 : vector<4xf32> to vector<4x1xf32>
    %cst_8 = arith.constant 3.906250e-03 : f32
    %11 = vector.broadcast %cst_8 : f32 to vector<4x1xf32>
    %12 = arith.mulf %10, %11 : vector<4x1xf32>
    %13 = arith.addf %12, %8 : vector<4x1xf32>
    %c0_9 = arith.constant 0 : index
    %c0_10 = arith.constant 0 : index
    %14 = vector.load %arg2[%c0_9, %c0_10] : memref<8x4xf32, #tpu.memory_space<vmem>>, vector<8x4xf32>
    %c0_11 = arith.constant 0 : index
    %c0_12 = arith.constant 0 : index
    %15 = vector.load %arg3[%c0_11, %c0_12] : memref<4x8xf32, #tpu.memory_space<vmem>>, vector<4x8xf32>
    %c0_13 = arith.constant 0 : index
    %c0_14 = arith.constant 0 : index
    %16 = vector.load %arg4[%c0_13, %c0_14] : memref<8x1xf32, #tpu.memory_space<vmem>>, vector<8x1xf32>
    %c0_15 = arith.constant 0 : index
    %c0_16 = arith.constant 0 : index
    %17 = vector.load %arg5[%c0_15, %c0_16] : memref<8x1xf32, #tpu.memory_space<vmem>>, vector<8x1xf32>
    %cst_17 = arith.constant 6.250000e-02 : f32
    %18 = vector.broadcast %cst_17 : f32 to vector<4x16xf32>
    %19 = arith.mulf %2, %18 : vector<4x16xf32>
    %cst_18 = arith.constant dense<0.000000e+00> : vector<8x16xf32>
    %20 = tpu.matmul %14, %19, %cst_18 {dimension_numbers = #tpu.dot_dimension_numbers<[1], [0], [0], [1], [0, 0, 1, 1], [], []>} : vector<8x4xf32>, vector<4x16xf32>, vector<8x16xf32> -> vector<8x16xf32>
    %21 = vector.broadcast %16 : vector<8x1xf32> to vector<8x16xf32>
    %22 = arith.mulf %21, %20 : vector<8x16xf32>
    %23 = vector.broadcast %17 : vector<8x1xf32> to vector<8x16xf32>
    %24 = arith.addf %22, %23 : vector<8x16xf32>
    %cst_19 = arith.constant 0.000000e+00 : f32
    %25 = vector.broadcast %cst_19 : f32 to vector<8x16xf32>
    %26 = arith.maximumf %24, %25 : vector<8x16xf32>
    %cst_20 = arith.constant dense<0.000000e+00> : vector<4x16xf32>
    %27 = tpu.matmul %15, %26, %cst_20 {dimension_numbers = #tpu.dot_dimension_numbers<[1], [0], [0], [1], [0, 0, 1, 1], [], []>} : vector<4x8xf32>, vector<8x16xf32>, vector<4x16xf32> -> vector<4x16xf32>
    %28 = arith.negf %27 : vector<4x16xf32>
    %29 = math.exp %28 : vector<4x16xf32>
    %cst_21 = arith.constant 1.000000e+00 : f32
    %30 = vector.broadcast %cst_21 : f32 to vector<4x16xf32>
    %31 = arith.addf %30, %29 : vector<4x16xf32>
    %32 = arith.divf %30, %31 : vector<4x16xf32>
    %c0_22 = arith.constant 0 : index
    %c0_23 = arith.constant 0 : index
    %33 = vector.load %arg7[%c0_22, %c0_23] : memref<4x16xf32, #tpu.memory_space<vmem>>, vector<4x16xf32>
    tpu.vector_store %arg7[%c0_22, %c0_23], %32 {strides = array<i32>} : memref<4x16xf32, #tpu.memory_space<vmem>>, vector<4x16xf32>,
    %cst_24 = arith.constant dense<0.000000e+00> : vector<8x16xf32>
    %34 = tpu.matmul %14, %5, %cst_24 {dimension_numbers = #tpu.dot_dimension_numbers<[1], [0], [0], [1], [0, 0, 1, 1], [], []>} : vector<8x4xf32>, vector<4x16xf32>, vector<8x16xf32> -> vector<8x16xf32>
    %35 = vector.broadcast %16 : vector<8x1xf32> to vector<8x16xf32>
    %36 = arith.mulf %35, %34 : vector<8x16xf32>
    %37 = vector.broadcast %17 : vector<8x1xf32> to vector<8x16xf32>
    %38 = arith.addf %36, %37 : vector<8x16xf32>
    %cst_25 = arith.constant 0.000000e+00 : f32
    %39 = vector.broadcast %cst_25 : f32 to vector<8x16xf32>
    %40 = arith.maximumf %38, %39 : vector<8x16xf32>
    %cst_26 = arith.constant dense<0.000000e+00> : vector<4x16xf32>
    %41 = tpu.matmul %15, %40, %cst_26 {dimension_numbers = #tpu.dot_dimension_numbers<[1], [0], [0], [1], [0, 0, 1, 1], [], []>} : vector<4x8xf32>, vector<8x16xf32>, vector<4x16xf32> -> vector<4x16xf32>
    %42 = arith.negf %41 : vector<4x16xf32>
    %43 = math.exp %42 : vector<4x16xf32>
    %cst_27 = arith.constant 1.000000e+00 : f32
    %44 = vector.broadcast %cst_27 : f32 to vector<4x16xf32>
    %45 = arith.addf %44, %43 : vector<4x16xf32>
    %46 = arith.divf %44, %45 : vector<4x16xf32>
    %cst_28 = arith.constant dense<0.000000e+00> : vector<8x1xf32>
    %47 = tpu.matmul %14, %13, %cst_28 {dimension_numbers = #tpu.dot_dimension_numbers<[1], [0], [0], [1], [0, 0, 1, 1], [], []>} : vector<8x4xf32>, vector<4x1xf32>, vector<8x1xf32> -> vector<8x1xf32>
    %cst_29 = arith.constant 0.000000e+00 : f32
    %48 = vector.broadcast %cst_29 : f32 to vector<8x1xf32>
    %49 = arith.maximumf %47, %48 : vector<8x1xf32>
    %cst_30 = arith.constant dense<0.000000e+00> : vector<4x1xf32>
    %50 = tpu.matmul %15, %49, %cst_30 {dimension_numbers = #tpu.dot_dimension_numbers<[1], [0], [0], [1], [0, 0, 1, 1], [], []>} : vector<4x8xf32>, vector<8x1xf32>, vector<4x1xf32> -> vector<4x1xf32>
    %51 = vector.shape_cast %46 : vector<4x16xf32> to vector<4x1x16xf32>
    %52 = vector.shape_cast %50 : vector<4x1xf32> to vector<4x1x1xf32>
    %c0_31 = arith.constant 0 : index
    %c0_32 = arith.constant 0 : index
    %c0_33 = arith.constant 0 : index
    %c0_34 = arith.constant 0 : index
    %53 = vector.load %arg1[%c0_31, %c0_32, %c0_33, %c0_34] : memref<1x4x16x16xf32, #tpu.memory_space<vmem>>, vector<1x4x16x16xf32>
    %54 = vector.shape_cast %53 : vector<1x4x16x16xf32> to vector<4x16x16xf32>
    %c0_35 = arith.constant 0 : index
    %c0_36 = arith.constant 0 : index
    %55 = vector.load %arg7[%c0_35, %c0_36] : memref<4x16xf32, #tpu.memory_space<vmem>>, vector<4x16xf32>
    %56 = vector.shape_cast %55 : vector<4x16xf32> to vector<4x16x1xf32>
    %57 = vector.broadcast %56 : vector<4x16x1xf32> to vector<4x16x16xf32>
    %58 = vector.broadcast %51 : vector<4x1x16xf32> to vector<4x16x16xf32>
    %59 = arith.mulf %57, %58 : vector<4x16x16xf32>
    %60 = vector.broadcast %52 : vector<4x1x1xf32> to vector<4x16x16xf32>
    %61 = arith.addf %59, %60 : vector<4x16x16xf32>
    %62 = arith.mulf %54, %61 : vector<4x16x16xf32>
    %c0_37 = arith.constant 0 : index
    %c0_38 = arith.constant 0 : index
    %c0_39 = arith.constant 0 : index
    %c0_40 = arith.constant 0 : index
    %63 = vector.load %arg6[%c0_37, %c0_38, %c0_39, %c0_40] : memref<1x4x16x16xf32, #tpu.memory_space<vmem>>, vector<1x4x16x16xf32>
    %64 = vector.shape_cast %63 : vector<1x4x16x16xf32> to vector<4x16x16xf32>
    %65 = vector.shape_cast %62 : vector<4x16x16xf32> to vector<1x4x16x16xf32>
    tpu.vector_store %arg6[%c0_37, %c0_38, %c0_39, %c0_40], %65 {strides = array<i32>} : memref<1x4x16x16xf32, #tpu.memory_space<vmem>>, vector<1x4x16x16xf32>,
    return
  }
  func.func @transform_0(%arg0: i32) -> (i32, i32, i32, i32) {
    %c0_i32 = arith.constant 0 : i32
    %c0_i32_0 = arith.constant 0 : i32
    %c0_i32_1 = arith.constant 0 : i32
    %c0_i32_2 = arith.constant 0 : i32
    return %arg0, %c0_i32, %c0_i32_0, %c0_i32_1 : i32, i32, i32, i32
  }
  func.func @transform_1(%arg0: i32) -> (i32, i32) {
    %c0_i32 = arith.constant 0 : i32
    %c0_i32_0 = arith.constant 0 : i32
    %c0_i32_1 = arith.constant 0 : i32
    return %c0_i32, %c0_i32_0 : i32, i32
  }
  func.func @transform_2(%arg0: i32) -> (i32, i32) {
    %c0_i32 = arith.constant 0 : i32
    %c0_i32_0 = arith.constant 0 : i32
    %c0_i32_1 = arith.constant 0 : i32
    return %c0_i32, %c0_i32_0 : i32, i32
  }
  func.func @transform_3(%arg0: i32) -> (i32, i32) {
    %c0_i32 = arith.constant 0 : i32
    %c0_i32_0 = arith.constant 0 : i32
    %c0_i32_1 = arith.constant 0 : i32
    return %c0_i32, %c0_i32_0 : i32, i32
  }
  func.func @transform_4(%arg0: i32) -> (i32, i32) {
    %c0_i32 = arith.constant 0 : i32
    %c0_i32_0 = arith.constant 0 : i32
    %c0_i32_1 = arith.constant 0 : i32
    return %c0_i32, %c0_i32_0 : i32, i32
  }
  func.func @transform_5(%arg0: i32) -> (i32, i32, i32, i32) {
    %c0_i32 = arith.constant 0 : i32
    %c0_i32_0 = arith.constant 0 : i32
    %c0_i32_1 = arith.constant 0 : i32
    %c0_i32_2 = arith.constant 0 : i32
    return %arg0, %c0_i32, %c0_i32_0, %c0_i32_1 : i32, i32, i32, i32
  }
}

</mosaic_0001>

<bundles_post_ra>
// kernel: tpu_custom_call.1
= control target key start
LH: loop header
LB: loop body
LE: loop exit
PB: predicated region body
PF: predicated region fallthrough
CT: control target
= control target key end

     0   :  { %10 = vsyncpa [#allocation4], 0  ;;  %s1333_s0 = inlined_call_operand.hbm [shape: f32[2,4,16,16], index: 0, kind: input, shape index: {}]   ;;  %s1334_s1 = inlined_call_operand.vmem [shape: f32[8,4], index: 1, kind: input, shape index: {}]   ;;  %s1335_s2 = inlined_call_operand.vmem [shape: f32[4,8], index: 2, kind: input, shape index: {}]   ;;  %s1336_s3 = inlined_call_operand.vmem [shape: f32[8,1], index: 3, kind: input, shape index: {}]   ;;  %s1337_s4 = inlined_call_operand.vmem [shape: f32[8,1], index: 4, kind: input, shape index: {}]   ;;  %s1338_s5 = inlined_call_operand.hbm [shape: f32[2,4,16,16], index: 5, kind: output, shape index: {}]  }
   0x1   :  { %12 = vsyncpa [#allocation4 + $0x1], 0 }
   0x2   :  { %13 = vsyncpa [#allocation5], 0 }
   0x3   :  { %15 = vsyncpa [#allocation5 + $0x1], 0  ;;  %s1074_s18 = smov 0   ;;  %s1076_s19 = smov 0  }
   0x4   :  { %s1078_s20 = smov 0   ;;  %s1080_s21 = smov 0  }
   0x5 LB: > { %s1095_s22 = sadd.s32 4294967295, %s1037_s21   ;;  %s846_s23 = sadd.s32 4294967294, %s1037_s21   ;;  %s1037_s21 = sphi %s1080_s21, %s1348_s21   ;;  %s1033_s20 = sphi %s1078_s20, %s1347_s20   ;;  %s1029_s19 = sphi %s1076_s19, %s1346_s19   ;;  %s1025_s18 = sphi %s1074_s18, %s1345_s18  }
   0x6   : > { %s1099_s24 = sadd.s32 1, %s1037_s21   ;;  %s28_s25 = sadd.s32 1, %s1033_s20 }
   0x7   : > { %s25_s26 = ssub.s32 %s1037_s21, %s1099_s24  ;;  %p35_p0 = scmp.ne.s32.totalorder %s1033_s20, %s1029_s19 }
   0x8   : > { %p26_p1 = scmp.eq.s32.totalorder %s25_s26, 0  ;;  %p36_p2 = scmp.eq.s32.totalorder %s1037_s21, 0 }
   0x9   : > { %p41_p3 = scmp.ne.s32.totalorder %s1029_s19, %s1025_s18  ;;  %p42_p4 = scmp.eq.s32.totalorder %s1095_s22, 0 }
   0xa   : > { %s1111_s27 = scalar_select %p26_p1, %s1033_s20, %s28_s25  }
   0xb   : > { %p1113_p5 = por %p36_p2, %p35_p0  ;;  %p1117_p6 = por %p42_p4, %p41_p3 }
   0xc   : > { %p149_p7 = scmp.eq.s32.totalorder %s1095_s22, 1  ;;  %p155_p8 = scmp.eq.s32.totalorder %s846_s23, 1 }
   0xd   : > { %p885_p10 = scmp.lt.s32.totalorder %s1037_s21, 2  ;;  %s187_s7 = sand.u32 1, %s1033_s20  }
   0xe   : > { %p1124_p11 = por %p149_p7, %p35_p0  ;;  %p1128_p12 = por %p155_p8, %p41_p3 }
   0xf   : > { %s871_s8 = sshll.u32 %s1037_s21, 6  ;;  %s849_s9 = sshll.u32 %s187_s7, 6 }
  0x10   : > { %s196_s12 = scalar_lea.hbm %s1333_s0, %s871_s8  ;;  %s191_s14 = scalar_lea.vmem [#allocation3], %s849_s9 }
  0x11   : > { %s197_s13 = sshll.u32 %s196_s12, 4  ;;  %s199_s15 = sshll.u32 %s191_s14, 4  ;;  %s198_s13 = int_to_ptr.hbm [resolvable:$true] %s197_s13  ;;  %s200_s15 = int_to_ptr.vmem [resolvable:$true] %s199_s15 }
  0x12   : > { %p1139_p13 = pnand %p885_p10, %p1113_p5  ;;  %p852_p0 = scmp.ge.s32.totalorder %s1037_s21, 1 }
  0x13   : > { %p207_p1 = scmp.lt.s32.totalorder %s1037_s21, 3  ;;  %s188_s17 = scalar_lea.sflag [#allocation4], %s187_s7 }
  0x14   : > { %s941_s23 = sshra.s32 %s198_s13, 4  ;;  %p945_p3 = pneg %p1139_p13  ;;  %s942_s23 = int_to_ptr.hbm [resolvable:$true] %s941_s23 }
  0x15   : > { %s943_s25 = scalar_lea.hbm %s942_s23, 64  ;;  %s948_s28 = scalar_lea.hbm %s1333_s0, 128 }
  0x16   : > { %p944_p2 = scmp.ne.s32.totalorder %s942_s23, %s943_s25  ;;  %p949_p5 = scmp.lt.s32.totalorder %s942_s23, %s1333_s0 }
  0x17   : > { %p950_p8 = scmp.lt.s32.totalorder %s948_s28, %s943_s25 }
  0x18   : > { %p946_p4 = pnand %p945_p3, %p944_p2 }
  0x19   : > { %p951_p10 = por %p950_p8, %p949_p5 }
  0x1a   : > { %p947_p7 = pneg %p946_p4 }
  0x1c   : > { %p952_p9 = pnand %p951_p10, %p947_p7 }
  0x1e   : > { %955 = shalt.err (!%p952_p9)
}
  0x1f   : > { %s1039_s7 = smov 128   ;;  %s1040_s11 = smov 8  }
  0x20   : > { %880 = dma.hbm_to_vmem [thread:$0]  (!%p1139_p13), %s198_s13, 1024, %s200_s15, %s188_s17, %s1039_s7, %s1039_s7, %s1040_s11  }
  0x21   : > { %p208_p2 = pnand %p852_p0, %p207_p1 }
  0x22   : > { %s1160_s12 = sand.u32 (!%p208_p2), 1, %s1029_s19  }
  0x23   : > { %211 = sbr.rel (%p208_p2) target bundleno = 693 (0x2b5), region = 40  ;;  %s853_s14 = sshll.u32 (!%p208_p2), %s1160_s12, 6 }
  0x24   : > { %s214_s23 = scalar_lea.sflag (!%p208_p2), [#allocation4], %s1160_s12  ;;  %s217_s25 = scalar_lea.vmem (!%p208_p2), [#allocation3], %s853_s14 }
  0x28   : > { %1016 = dma.done.wait (%p1117_p6), %s214_s23, 1024  }
  0x29   : > { %1018 = vsyncadd (%p1117_p6), %s214_s23, 4294966272  ;;  %vm253_vm0 = vcmask 130048   ;;  %v1170_v0 = vld [vmem:[%s217_s25 + $0x20] sm:$0xff]  ;;  %v1172_v1 = vld [vmem:[%s217_s25 + $0x10] sm:$0xff]  ;;  %vm350_vm1 = vcmask 1041409   ;;  %vm352_vm2 = vcmask 1042434  }
  0x2a   : > { %v1174_v2 = vld [vmem:[%s217_s25] sm:$0xff]  ;;  %v266_v3 = vsel %vm253_vm0, %v1170_v0, 0.0  ;;  %v260_v4 = vsel %vm253_vm0, %v1172_v1, 0.0  ;;  %v1180_v5 = vld [vmem:[%s217_s25 + $0x28] sm:$0xff]  ;;  %v1182_v6 = vld [vmem:[%s217_s25 + $0x18] sm:$0xff]  ;;  %v319_v20 = vsel %vm253_vm0, %v1172_v1, -inf }
  0x2b   : > { %267 = vadd.xlane.f32.xlu2 %v266_v3  ;;  %261 = vadd.xlane.f32.xlu1 %v260_v4  ;;  %v254_v7 = vsel %vm253_vm0, %v1174_v2, 0.0  ;;  %v269_v8 = vsel %vm253_vm0, %v1180_v5, 0.0  ;;  %v1188_v9 = vld [vmem:[%s217_s25 + $0x8] sm:$0xff]  ;;  %v263_v11 = vsel %vm253_vm0, %v1182_v6, 0.0  ;;  %v1194_v15 = vld [vmem:[%s217_s25 + $0x38] sm:$0xff]  ;;  %v1196_v16 = vld [vmem:[%s217_s25 + $0x30] sm:$0xff] }
  0x2c   : > { %255 = vadd.xlane.f32.xlu0 %v254_v7  ;;  %v292_v10 = vadd.f32 %v269_v8, %v266_v3  ;;  %v285_v12 = vadd.f32 %v263_v11, %v260_v4  ;;  %v257_v13 = vsel %vm253_vm0, %v1188_v9, 0.0  ;;  %v275_v17 = vsel %vm253_vm0, %v1194_v15, 0.0  ;;  %s1275_s9 = scalar_lea.vmem [#allocation6], %s853_s14  ;;  %s872_s10 = sshll.u32 %s1095_s22, 6 }
  0x2d   : > { %v278_v14 = vadd.f32 %v257_v13, %v254_v7  ;;  %v272_v18 = vsel %vm253_vm0, %v1196_v16, 0.0  ;;  %v310_v21 = vsel %vm253_vm0, %v1174_v2, -inf  ;;  %v320_v22 = vsel %vm253_vm0, %v1182_v6, -inf  ;;  %s769_s14 = scalar_lea.hbm %s1338_s5, %s872_s10  ;;  %s770_s22 = sshll.u32 %s1275_s9, 4  ;;  %s771_s22 = int_to_ptr.vmem [resolvable:$true] %s770_s22 }
  0x2e   : > { %v299_v19 = vadd.f32 %v275_v17, %v272_v18  ;;  %v311_v23 = vsel %vm253_vm0, %v1188_v9, -inf  ;;  %v328_v24 = vsel %vm253_vm0, %v1170_v0, -inf  ;;  %v329_v25 = vsel %vm253_vm0, %v1180_v5, -inf  ;;  %s772_s23 = sshll.u32 %s769_s14, 4  ;;  %s758_s25 = scalar_lea.sflag [#allocation5], %s1160_s12  ;;  %s773_s23 = int_to_ptr.hbm [resolvable:$true] %s772_s23 }
  0x2f   : > { %v321_v26 = vmax.f32 %v319_v20, %v320_v22  ;;  %v312_v27 = vmax.f32 %v310_v21, %v311_v23  ;;  %v330_v28 = vmax.f32 %v328_v24, %v329_v25  ;;  %v286_v29 = vrot.slane %v285_v12, 4  ;;  %s985_s29 = sshra.s32 %s773_s23, 4  ;;  %s991_s17 = scalar_lea.hbm %s1338_s5, 128  ;;  %s986_s29 = int_to_ptr.hbm [resolvable:$true] %s985_s29 }
  0x30   : > { %v338_v30 = vsel %vm253_vm0, %v1194_v15, -inf  ;;  %v337_v31 = vsel %vm253_vm0, %v1196_v16, -inf  ;;  %v279_v34 = vrot.slane %v278_v14, 4  ;;  %v293_v35 = vrot.slane %v292_v10, 4  ;;  %s987_s13 = scalar_lea.hbm %s986_s29, 64  ;;  %p992_p0 = scmp.lt.s32.totalorder %s986_s29, %s1338_s5 }
  0x31   : > { %v322_v32 = vrot.slane %v321_v26, 4  ;;  %v313_v33 = vrot.slane %v312_v27, 4  ;;  %v339_v36 = vmax.f32 %v337_v31, %v338_v30  ;;  %v331_v37 = vrot.slane %v330_v28, 4  ;;  %p988_p6 = scmp.ne.s32.totalorder %s986_s29, %s987_s13  ;;  %p993_p1 = scmp.lt.s32.totalorder %s991_s17, %s987_s13 }
  0x32   : > { %v287_v38 = vadd.f32 %v286_v29, %v285_v12  ;;  %v280_v41 = vadd.f32 %v279_v34, %v278_v14  ;;  %v294_v42 = vadd.f32 %v293_v35, %v292_v10  ;;  %v300_v53 = vrot.slane %v299_v19, 4 }
  0x33   : > { %270 = vadd.xlane.f32.xlu2 %v269_v8  ;;  %264 = vadd.xlane.f32.xlu1 %v263_v11  ;;  %v323_v39 = vmax.f32 %v321_v26, %v322_v32  ;;  %v314_v40 = vmax.f32 %v312_v27, %v313_v33  ;;  %v340_v43 = vrot.slane %v339_v36, 4  ;;  %v332_v44 = vmax.f32 %v330_v28, %v331_v37  ;;  %v396_v28 = vld [vmem:[%s1336_s3] sm:$0xff]  ;;  %p989_p9 = pnand %p988_p6, %p1124_p11  ;;  %p994_p3 = por %p993_p1, %p992_p0 }
  0x34   : > { %258 = vadd.xlane.f32.xlu0 %v257_v13  ;;  %v288_v45 = vrot.slane %v287_v38, 2  ;;  %v281_v48 = vrot.slane %v280_v41, 2  ;;  %v295_v49 = vrot.slane %v294_v42, 2  ;;  %v301_v61 = vadd.f32 %v300_v53, %v299_v19 }
  0x35   : > { %v324_v46 = vrot.slane %v323_v39, 2  ;;  %v315_v47 = vrot.slane %v314_v40, 2  ;;  %v341_v50 = vmax.f32 %v339_v36, %v340_v43  ;;  %v333_v51 = vrot.slane %v332_v44, 2  ;;  %p990_p13 = pneg %p989_p9 }
  0x36   : > { %v289_v52 = vadd.f32 %v288_v45, %v287_v38  ;;  %v282_v56 = vadd.f32 %v281_v48, %v280_v41  ;;  %v296_v57 = vadd.f32 %v295_v49, %v294_v42  ;;  %v302_v11 = vrot.slane %v301_v61, 2 }
  0x37   : > { %v325_v54 = vmax.f32 %v323_v39, %v324_v46  ;;  %v316_v55 = vmax.f32 %v314_v40, %v315_v47  ;;  %v342_v58 = vrot.slane %v341_v50, 2  ;;  %v334_v59 = vmax.f32 %v332_v44, %v333_v51  ;;  %v1233_v40 = vld [vmem:[%s1334_s1] sm:$0xff]  ;;  %p995_p4 = pnand %p994_p3, %p990_p13 }
  0x38   : > { %v290_v60 = vrot.slane %v289_v52, 1  ;;  %v283_v3 = vrot.slane %v282_v56, 1  ;;  %v297_v4 = vrot.slane %v296_v57, 1  ;;  %v303_v21 = vadd.f32 %v302_v11, %v301_v61 }
  0x39   : > { %v326_v62 = vrot.slane %v325_v54, 1  ;;  %v317_v63 = vrot.slane %v316_v55, 1  ;;  %v343_v7 = vmax.f32 %v341_v50, %v342_v58  ;;  %v335_v8 = vrot.slane %v334_v59, 1 }
  0x3a   : > { %v291_v10 = vadd.f32 %v290_v60, %v289_v52  ;;  %v284_v14 = vadd.f32 %v283_v3, %v282_v56  ;;  %vm354_vm3 = vcmask 1043459   ;;  %vm357_vm4 = vcmask 125952  }
  0x3b   : > { %276 = vadd.xlane.f32.xlu1 %v275_v17  ;;  %v327_v12 = vmax.f32 %v325_v54, %v326_v62  ;;  %v318_v13 = vmax.f32 %v316_v55, %v317_v63  ;;  %v298_v17 = vadd.f32 %v297_v4, %v296_v57  ;;  %v336_v22 = vmax.f32 %v334_v59, %v335_v8 }
  0x3c   : > { %273 = vadd.xlane.f32.xlu0 %v272_v18  ;;  %v344_v18 = vrot.slane %v343_v7, 1  ;;  %v307_v20 = vmul.f32 0.0625, %v291_v10  ;;  %v306_v23 = vmul.f32 0.0625, %v284_v14  ;;  %v304_v29 = vrot.slane %v303_v21, 1 }
  0x3d   : > { %v351_v24 = vsel %vm350_vm1, %v327_v12, %v318_v13  ;;  %v308_v30 = vmul.f32 0.0625, %v298_v17  ;;  %v1041_v32 = vmov 0   ;;  %vm433_vm5 = vcmask 1043456  }
  0x3e   : > { %v345_v19 = vmax.f32 %v343_v7, %v344_v18  ;;  %v353_v25 = vsel %vm352_vm2, %v336_v22, %v351_v24  ;;  %v517_v31 = vsel %vm350_vm1, %v307_v20, %v306_v23  ;;  %924 = vset.pattern.permute.xlu1 %v1041_v32  ;;  %925 = vset.pattern.permute.xlu2 %v1041_v32  ;;  %v369_v37 = vlaneseq }
  0x3f   : > { %v305_v33 = vadd.f32 %v304_v29, %v303_v21  ;;  %v518_v34 = vsel %vm352_vm2, %v308_v30, %v517_v31  ;;  %vm429_vm6 = vcmask 31744   ;;  %vm374_vm7 = vcmask 130112  }
  0x40   : > { %v355_v26 = vsel %vm354_vm3, %v345_v19, %v353_v25  ;;  %v370_v42 = vand.u32 127, %v369_v37  ;;  %vm469_vm8 = vcmask 64512  }
  0x41   : > { %v358_v27 = vsel %vm357_vm4, %v355_v26, -inf  ;;  %v309_v35 = vmul.f32 0.0625, %v305_v33  ;;  %v397_v33 = vld [vmem:[%s1337_s4] sm:$0xff] }
  0x42   : > { %v372_v43 = vadd.s32 4294967288, %v370_v42 }
  0x43   : > { %v519_v36 = vsel %vm354_vm3, %v309_v35, %v518_v34 }
  0x44   : > { %359 = vmax.xlane.f32.xlu0 %v358_v27  ;;  %859 = vmatpush.msk.msra.mxu2 %vm433_vm5, %v519_v36 }
  0x45   : > { %860 = vmatmul.msk.f32.vlgmr.msra.gmra.mxu2 %vm429_vm6, %v1233_v40 }
  0x54   : > { %458 = vperm.xlu1 %924, %v396_v28  }
  0x9e   : > { %v268_v38 = vpop.xlane.xlu2 %267  ;;  %v262_v39 = vpop.xlane.xlu1 %261 }
  0x9f   : > { %v256_v41 = vpop.xlane.xlu0 %255  ;;  %v400_v46 = vmul.f32 0.0625, %v262_v39  ;;  %v402_v53 = vmul.f32 0.0625, %v268_v38  ;;  %v376_v55 = vperm.slane %v262_v39, %v370_v42  ;;  %v379_v59 = vperm.slane %v268_v38, %v370_v42 }
  0xa0   : > { %v398_v49 = vmul.f32 0.0625, %v256_v41  ;;  %v371_v56 = vperm.slane %v256_v41, %v370_v42 }
  0xa1   : > { %v417_v61 = vperm.slane %v400_v46, %v370_v42  ;;  %v420_v4 = vperm.slane %v402_v53, %v370_v42 }
  0xa2   : > { %v414_v62 = vperm.slane %v398_v49, %v370_v42 }
  0xa6   : > { %v271_v44 = vpop.xlane.xlu2 %270  ;;  %v265_v45 = vpop.xlane.xlu1 %264 }
  0xa7   : > { %v401_v47 = vmul.f32 0.0625, %v265_v45  ;;  %v259_v48 = vpop.xlane.xlu0 %258  ;;  %v377_v50 = vperm.slane %v265_v45, %v372_v43  ;;  %v403_v54 = vmul.f32 0.0625, %v271_v44  ;;  %v380_v60 = vperm.slane %v271_v44, %v372_v43 }
  0xa8   : > { %v373_v51 = vperm.slane %v259_v48, %v372_v43  ;;  %v399_v52 = vmul.f32 0.0625, %v259_v48  ;;  %v395_v48 = vld [vmem:[%s1335_s2] sm:$0xf] }
  0xa9   : > { %v418_v57 = vperm.slane %v401_v47, %v372_v43  ;;  %v378_v63 = vsel %vm374_vm7, %v377_v50, %v376_v55  ;;  %v421_v7 = vperm.slane %v403_v54, %v372_v43  ;;  %v381_v17 = vsel %vm374_vm7, %v380_v60, %v379_v59 }
  0xaa   : > { %v415_v58 = vperm.slane %v399_v52, %v372_v43  ;;  %v375_v3 = vsel %vm374_vm7, %v373_v51, %v371_v56 }
  0xab   : > { %v419_v11 = vsel %vm374_vm7, %v418_v57, %v417_v61  ;;  %v385_v18 = vsel %vm350_vm1, %v378_v63, %v375_v3  ;;  %v422_v23 = vsel %vm374_vm7, %v421_v7, %v420_v4 }
  0xac   : > { %v416_v10 = vsel %vm374_vm7, %v415_v58, %v414_v62  ;;  %v386_v26 = vsel %vm352_vm2, %v381_v17, %v385_v18 }
  0xad   : > { %v426_v19 = vsel %vm350_vm1, %v419_v11, %v416_v10 }
  0xae   : > { %v277_v8 = vpop.xlane.xlu1 %276  ;;  %v427_v30 = vsel %vm352_vm2, %v422_v23, %v426_v19 }
  0xaf   : > { %v383_v12 = vperm.slane %v277_v8, %v372_v43  ;;  %v405_v13 = vmul.f32 0.0625, %v277_v8  ;;  %v274_v14 = vpop.xlane.xlu0 %273 }
  0xb0   : > { %v382_v20 = vperm.slane %v274_v14, %v370_v42  ;;  %v404_v21 = vmul.f32 0.0625, %v274_v14 }
  0xb1   : > { %v424_v22 = vperm.slane %v405_v13, %v372_v43 }
  0xb2   : > { %v423_v24 = vperm.slane %v404_v21, %v370_v42  ;;  %v384_v25 = vsel %vm374_vm7, %v383_v12, %v382_v20 }
  0xb3   : > { %v387_v27 = vsel %vm354_vm3, %v384_v25, %v386_v26 }
  0xb4   : > { %v389_v28 = vsel %vm357_vm4, %v387_v27, 0.0  ;;  %v425_v29 = vsel %vm374_vm7, %v424_v22, %v423_v24 }
  0xb5   : > { %390 = vadd.xlane.f32.xlu2 %v389_v28  ;;  %v428_v31 = vsel %vm354_vm3, %v425_v29, %v427_v30 }
  0xb6   : > { %855 = vmatpush.msk.msra.mxu0 %vm433_vm5, %v428_v31 }
  0xb7   : > { %856 = vmatmul.msk.f32.vlgmr.msra.gmra.mxu0 %vm429_vm6, %v1233_v40  ;;  %v360_v35 = vpop.xlane.xlu0 %359 }
  0xc6   : > { %v459_v41 = vpop.permute.xlu1 %458 }
  0xc8   : > { %v539_v38 = vpop.f32.mrf.mxu2 }
  0xc9   : > { %v542_v42 = vmul.f32 %v539_v38, %v459_v41 }
  0xcd   : > { %464 = vperm.xlu2 %925, %v397_v33  }
 0x128   : > { %v391_v34 = vpop.xlane.xlu2 %390 }
 0x129   : > { %v392_v36 = vmul.f32 0.00390625, %v391_v34 }
 0x12b   : > { %v393_v39 = vadd.f32 %v392_v36, %v360_v35 }
 0x12d   : > { %863 = vmatpush.msk.msrb.mxu0 %vm433_vm5, %v393_v39 }
 0x12e   : > { %864 = vmatmul.msk.f32.vlgmr.msrb.gmra.mxu0 %vm429_vm6, %v1233_v40  ;;  %v647_v40 = vshrl.u32 %v369_v37, 7 }
 0x130   : > { %v465_v43 = vpop.permute.xlu2 %464  ;;  %926 = vset.pattern.permute.xlu0 %v647_v40  ;;  %928 = vset.pattern.permute.xlu1 %v647_v40  ;;  %v654_v53 = vadd.s32 8, %v647_v40 }
 0x131   : > { %v543_v44 = vadd.f32 %v542_v42, %v465_v43 }
 0x132   : > { %927 = vset.pattern.permute.xlu2 %v654_v53 }
 0x133   : > { %v544_v45 = vmax.f32 %v543_v44, 0.0 }
 0x134   : > { %v453_v46 = vpop.f32.mrf.mxu0 }
 0x135   : > { %v461_v47 = vmul.f32 %v459_v41, %v453_v46  ;;  %560 = vmatpush.msra.mxu3 %v544_v45 }
 0x136   : > { %861 = vmatmul.msk.f32.vlgmr.msra.gmra.mxu3 %vm469_vm8, %v395_v48 }
 0x137   : > { %v467_v49 = vadd.f32 %v465_v43, %v461_v47 }
 0x139   : > { %v468_v50 = vmax.f32 %v467_v49, 0.0 }
 0x13b   : > { %488 = vmatpush.msra.mxu1 %v468_v50 }
 0x13c   : > { %857 = vmatmul.msk.f32.vlgmr.msra.gmra.mxu1 %vm469_vm8, %v395_v48 }
 0x1ab   : > { %v604_v51 = vpop.f32.mrf.mxu0 }
 0x1ac   : > { %v607_v52 = vmax.f32 %v604_v51, 0.0 }
 0x1ae   : > { %623 = vmatpush.msrb.mxu1 %v607_v52 }
 0x1af   : > { %865 = vmatmul.msk.f32.vlgmr.msrb.gmra.mxu1 %vm469_vm8, %v395_v48 }
 0x1b9   : > { %v490_v54 = vpop.f32.mrf.mxu1  ;;  %v562_v24 = vpop.f32.mrf.mxu3 }
 0x1ba   : > { %v858_v55 = vmul.f32 -1.442695, %v490_v54  ;;  %v862_v25 = vmul.f32 -1.442695, %v562_v24 }
 0x1bc   : > { %933 = vpow2.f32 %v858_v55 }
 0x1c2   : > { %v934_v56 = vpop.eup %933 }
 0x1c3   : > { %v496_v57 = vadd.f32 1.0, %v934_v56 }
 0x1c5   : > { %935 = vrcp.f32 %v496_v57  ;;  %v508_v60 = vand.u32 2147483648, %v496_v57  ;;  %vm502_vm9 = vweird.f32 %v496_v57  ;;  %v506_v62 = vand.u32 2147483647, %v496_v57 }
 0x1c6   : > { %937 = vpow2.f32 %v862_v25 }
 0x1c7   : > { %v509_v37 = vor.u32 1.1754944e-38, %v508_v60  ;;  %vm507_vm12 = vcmp.eq.f32.partialorder %v506_v62, 8.507059e+37 }
 0x1cb   : > { %v936_v58 = vpop.eup %935 }
 0x1cc   : > { %v498_v59 = vmul.f32 %v936_v58, %v496_v57  ;;  %vm503_vm10 = vweird.f32 %v936_v58  ;;  %v938_v26 = vpop.eup %937 }
 0x1cd   : > { %vm504_vm11 = vmor %vm502_vm9, %vm503_vm10  ;;  %v568_v27 = vadd.f32 1.0, %v938_v26 }
 0x1ce   : > { %v499_v61 = vsub.f32 1.0, %v498_v59 }
 0x1cf   : > { %939 = vrcp.f32 %v568_v27  ;;  %vm574_vm13 = vweird.f32 %v568_v27  ;;  %v580_v34 = vand.u32 2147483648, %v568_v27  ;;  %v578_v36 = vand.u32 2147483647, %v568_v27 }
 0x1d0   : > { %v500_v63 = vmul.f32 %v936_v58, %v499_v61 }
 0x1d1   : > { %v581_v38 = vor.u32 1.1754944e-38, %v580_v34  ;;  %vm579_vm1 = vcmp.eq.f32.partialorder %v578_v36, 8.507059e+37 }
 0x1d2   : > { %v501_v3 = vadd.f32 %v936_v58, %v500_v63 }
 0x1d4   : > { %v505_v4 = vsel %vm504_vm11, %v936_v58, %v501_v3 }
 0x1d5   : > { %v510_v7 = vsel %vm507_vm12, %v509_v37, %v505_v4  ;;  %v940_v28 = vpop.eup %939 }
 0x1d6   : > { %512 = vst.msk [vmem:[#allocation2] sm:$0xf] %vm357_vm4, %v510_v7  ;;  %v570_v29 = vmul.f32 %v940_v28, %v568_v27  ;;  %vm575_vm14 = vweird.f32 %v940_v28 }
 0x1d7   : > { %vm576_vm15 = vmor %vm574_vm13, %vm575_vm14 }
 0x1d8   : > { %v571_v30 = vsub.f32 1.0, %v570_v29 }
 0x1da   : > { %v572_v33 = vmul.f32 %v940_v28, %v571_v30 }
 0x1dc   : > { %v573_v35 = vadd.f32 %v940_v28, %v572_v33 }
 0x1dd   : > { %v644_v8 = vld [vmem:[#allocation2] sm:$0xf] }
 0x1de   : > { %v658_v10 = vperm.slane %v644_v8, 1  ;;  %v645_v11 = vperm.slane %v644_v8, 0  ;;  %v671_v12 = vperm.slane %v644_v8, 2  ;;  %v684_v13 = vperm.slane %v644_v8, 3 }
 0x1df   : > { %v577_v39 = vsel %vm576_vm15, %v940_v28, %v573_v35 }
 0x1e0   : > { %663 = vperm.xlu1 %928, %v658_v10   ;;  %656 = vperm.xlu2 %927, %v645_v11   ;;  %v582_v42 = vsel %vm579_vm1, %v581_v38, %v577_v39 }
 0x1e1   : > { %650 = vperm.xlu0 %926, %v645_v11   ;;  %v697_v43 = vperm.slane %v582_v42, 0  ;;  %v630_v47 = vrot.slane %v582_v42, 2  ;;  %v629_v60 = vrot.slane %v582_v42, 1  ;;  %v631_v3 = vrot.slane %v582_v42, 3 }
 0x1e3   : > { %v699_v52 = vperm.slane %v630_v47, 0  ;;  %v698_v62 = vperm.slane %v629_v60, 0 }
 0x1e8   : > { %676 = vperm.xlu1 %928, %v671_v12   ;;  %669 = vperm.xlu2 %927, %v658_v10  }
 0x1e9   : > { %929 = vset.pattern.permute.xlu0 %v654_v53 }
 0x1f0   : > { %689 = vperm.xlu1 %928, %v684_v13   ;;  %682 = vperm.xlu2 %927, %v671_v12  }
 0x1f1   : > { %695 = vperm.xlu0 %929, %v684_v13  }
 0x1f8   : > { %930 = vset.pattern.permute.xlu2 %v1041_v32  ;;  %931 = vset.pattern.permute.xlu1 %v1041_v32 }
 0x1f9   : > { %932 = vset.pattern.permute.xlu0 %v1041_v32 }
 0x22c   : > { %v625_v14 = vpop.f32.mrf.mxu1 }
 0x22d   : > { %v633_v17 = vrot.slane %v625_v14, 1  ;;  %v713_v18 = vperm.slane %v625_v14, 0  ;;  %v634_v21 = vrot.slane %v625_v14, 2  ;;  %v635_v22 = vrot.slane %v625_v14, 3 }
 0x22f   : > { %718 = vperm.xlu2 %930, %v713_v18   ;;  %v714_v20 = vperm.slane %v633_v17, 0  ;;  %v715_v23 = vperm.slane %v634_v21, 0  ;;  %v716_v19 = vperm.slane %v635_v22, 0 }
 0x231   : > { %722 = vperm.xlu1 %931, %v714_v20  }
 0x237   : > { %726 = vperm.xlu2 %930, %v715_v23  }
 0x239   : > { %730 = vperm.xlu1 %931, %v716_v19  }
 0x23a   : > { %v657_v32 = vpop.permute.xlu2 %656 }
 0x23b   : > { %v706_v46 = vmul.f32 %v697_v43, %v657_v32 }
 0x242   : > { %v670_v31 = vpop.permute.xlu2 %669 }
 0x243   : > { %v708_v63 = vmul.f32 %v698_v62, %v670_v31 }
 0x24a   : > { %v683_v41 = vpop.permute.xlu2 %682 }
 0x24b   : > { %v710_v55 = vmul.f32 %v699_v52, %v683_v41 }
 0x252   : > { %v664_v44 = vpop.permute.xlu1 %663 }
 0x253   : > { %v651_v45 = vpop.permute.xlu0 %650  ;;  %v707_v37 = vmul.f32 %v698_v62, %v664_v44 }
 0x254   : > { %v705_v48 = vmul.f32 %v697_v43, %v651_v45 }
 0x25a   : > { %v677_v54 = vpop.permute.xlu1 %676 }
 0x25b   : > { %v709_v56 = vmul.f32 %v699_v52, %v677_v54 }
 0x262   : > { %v690_v61 = vpop.permute.xlu1 %689 }
 0x263   : > { %v696_v11 = vpop.permute.xlu0 %695 }
 0x289   : > { %v719_v49 = vpop.permute.xlu2 %718 }
 0x28a   : > { %v733_v50 = vadd.f32 %v719_v49, %v705_v48  ;;  %v734_v51 = vadd.f32 %v719_v49, %v706_v46 }
 0x28c   : > { %v741_v40 = vmul.f32 %v733_v50, %v1174_v2  ;;  %v742_v53 = vmul.f32 %v734_v51, %v1188_v9 }
 0x28e   : > { %749 = vst.msk [vmem:[%s1275_s9] sm:$0xff] %vm253_vm0, %v741_v40 }
 0x28f   : > { %750 = vst.msk [vmem:[%s1275_s9 + $0x8] sm:$0xff] %vm253_vm0, %v742_v53 }
 0x291   : > { %v727_v57 = vpop.permute.xlu2 %726 }
 0x292   : > { %v737_v58 = vadd.f32 %v727_v57, %v709_v56  ;;  %v738_v2 = vadd.f32 %v727_v57, %v710_v55 }
 0x294   : > { %v745_v9 = vmul.f32 %v737_v58, %v1170_v0  ;;  %v746_v59 = vmul.f32 %v738_v2, %v1180_v5  ;;  %v700_v0 = vperm.slane %v631_v3, 0 }
 0x296   : > { %753 = vst.msk [vmem:[%s1275_s9 + $0x20] sm:$0xff] %vm253_vm0, %v745_v9  ;;  %v711_v12 = vmul.f32 %v700_v0, %v690_v61  ;;  %v712_v13 = vmul.f32 %v700_v0, %v696_v11 }
 0x297   : > { %754 = vst.msk [vmem:[%s1275_s9 + $0x28] sm:$0xff] %vm253_vm0, %v746_v59 }
 0x2a3   : > { %v723_v4 = vpop.permute.xlu1 %722 }
 0x2a4   : > { %v735_v7 = vadd.f32 %v723_v4, %v707_v37  ;;  %v736_v8 = vadd.f32 %v723_v4, %v708_v63 }
 0x2a6   : > { %v743_v5 = vmul.f32 %v735_v7, %v1172_v1  ;;  %v744_v10 = vmul.f32 %v736_v8, %v1182_v6 }
 0x2a8   : > { %751 = vst.msk [vmem:[%s1275_s9 + $0x10] sm:$0xff] %vm253_vm0, %v743_v5 }
 0x2a9   : > { %752 = vst.msk [vmem:[%s1275_s9 + $0x18] sm:$0xff] %vm253_vm0, %v744_v10 }
 0x2ab   : > { %v731_v14 = vpop.permute.xlu1 %730 }
 0x2ac   : > { %v739_v1 = vadd.f32 %v731_v14, %v711_v12  ;;  %v740_v6 = vadd.f32 %v731_v14, %v712_v13 }
 0x2ae   : > { %v747_v17 = vmul.f32 %v739_v1, %v1196_v16  ;;  %v748_v18 = vmul.f32 %v740_v6, %v1194_v15 }
 0x2b0   : > { %755 = vst.msk [vmem:[%s1275_s9 + $0x30] sm:$0xff] %vm253_vm0, %v747_v17 }
 0x2b1   : > { %756 = vst.msk [vmem:[%s1275_s9 + $0x38] sm:$0xff] %vm253_vm0, %v748_v18 }
 0x2b2   : > { %998 = shalt.err (!%p995_p4)
}
 0x2b3   : > { %s1042_s12 = smov 128   ;;  %s1043_s28 = smov 8  }
 0x2b4   : > { %875 = dma.vmem_to_hbm [thread:$0]  (%p1124_p11), %s771_s22, 1024, %s773_s23, %s758_s25, %s1042_s12, %s1042_s12, %s1043_s28  }
 0x2b5 PF: > { %s787_s9 = sand.u32 1, %s1025_s18   ;;  %p1344_p7 = scmp.ge.s32.totalorder %s1037_s21, 2 }
 0x2b6   : > { %s788_s10 = scalar_lea.sflag [#allocation5], %s787_s9 }
 0x2b7   : > { %p882_p5 = pnand %p1344_p7, %p1128_p12 }
 0x2b9   : > { %p883_p8 = pneg %p882_p5 }
 0x2bb   : > { %1020 = dma.done.wait (%p883_p8), %s788_s10, 1024  }
 0x2bc   : > { %1022 = vsyncadd (%p883_p8), %s788_s10, 4294966272  ;;  %p18_p10 = scmp.ge.s32.totalorder %s1099_s24, 4   ;;  %s1345_s18 = smov %s1029_s19 }
 0x2bd   : > { %s1346_s19 = smov %s1033_s20  ;;  %s1347_s20 = smov %s1111_s27 }
 0x2be   : > { %s1348_s21 = smov %s1099_s24  ;;  %20 = sbr.rel (!%p18_p10) target bundleno = 5 (0x5), region = 85 }
 0x2c3   :  { %794 = vsyncpa [#allocation4], 1 }
 0x2c4   :  { %796 = vsyncpa [#allocation4 + $0x1], 1 }
 0x2c5   :  { %797 = vsyncpa [#allocation5], 1 }
 0x2c6   :  { %799 = vsyncpa [#allocation5 + $0x1], 1 }

</bundles_post_ra>
